<compile_context>
chip_gen: v7x
topology: tpu7x:2x2x1
jax: 0.10.0
libtpu: 0.0.40
codegen_flags: <defaults>
</compile_context>

<pallas_src>
import math

import jax
import jax.numpy as jnp
from jax import lax
from jax.experimental import pallas as pl
from jax.experimental.pallas import tpu as pltpu


LANE = 128  # TPU lane width; feature dims are zero-padded to multiples of this


# ----------------------------- small helpers --------------------------------
def _sigmoid(x):
    return 1.0 / (1.0 + jnp.exp(-x))


def _softplus(x):
    return jnp.where(x > 20.0, x, jnp.log(1.0 + jnp.exp(x)))


def _round_up(n, m):
    return ((n + m - 1) // m) * m


def _pick_tile(n, candidates):
    for c in candidates:
        if n % c == 0:
            return c
    return n


def _pad2d(a, rows, cols):
    return jnp.pad(a, ((0, rows - a.shape[0]), (0, cols - a.shape[1])))


# --------------------- Conv2d (im2col matmul) kernel -------------------------
def _conv_mm_kernel(p_ref, w_ref, b_ref, o_ref):
    # p_ref: (TM, K*K*Cin) bf16  w_ref: (K*K*Cin, Cp) bf16  b_ref: (1, Cp) f32
    acc = jnp.dot(p_ref[...], w_ref[...], preferred_element_type=jnp.float32)
    o_ref[...] = (acc + b_ref[...]).astype(o_ref.dtype)


def conv2d_reflect(x_nhwc, weight, bias, cout_pad, *, kernel_size=4, stride=2, pad=1):
    """ReflectionPad2d(pad) + Conv2d(kernel_size, stride, padding=0), NHWC.
    Output channels are zero-padded to `cout_pad` (lane-dense) and emitted in
    bf16 so the Mamba stage reads a lane-dense, half-width intermediate.
    weight: [Cout, Cin, K, K] (PyTorch convention), bias: [Cout]."""
    B, H, W, Cin = x_nhwc.shape
    Cout = weight.shape[0]
    K = kernel_size

    xp = jnp.pad(x_nhwc, ((0, 0), (pad, pad), (pad, pad), (0, 0)), mode="reflect")
    Hp, Wp = H + 2 * pad, W + 2 * pad
    Ho = (Hp - K) // stride + 1
    Wo = (Wp - K) // stride + 1

    # TODO(synk): im2col still expands the input K*K-fold in HBM; for large
    # images replace with an in-kernel tap-accumulation gather from the padded
    # input (the conv stage is memory-bound).
    cols = []
    for kh in range(K):
        for kw in range(K):
            cols.append(xp[:, kh:kh + stride * Ho:stride, kw:kw + stride * Wo:stride, :])
    patches = (jnp.stack(cols, axis=3)
               .reshape(B * Ho * Wo, K * K * Cin).astype(jnp.bfloat16))

    wmat = jnp.transpose(weight, (2, 3, 1, 0)).reshape(K * K * Cin, Cout)
    wmat = _pad2d(wmat, K * K * Cin, cout_pad).astype(jnp.bfloat16)
    bmat = _pad2d(bias.reshape(1, Cout).astype(jnp.float32), 1, cout_pad)

    M, KKC = patches.shape
    TM = _pick_tile(M, (512, 256, 128, 64, 32, 16, 8))
    out = pl.pallas_call(
        _conv_mm_kernel,
        out_shape=jax.ShapeDtypeStruct((M, cout_pad), jnp.bfloat16),
        grid=(M // TM,),
        in_specs=[
            pl.BlockSpec((TM, KKC), lambda m: (m, 0)),
            pl.BlockSpec((KKC, cout_pad), lambda m: (0, 0)),   # resident weight
            pl.BlockSpec((1, cout_pad), lambda m: (0, 0)),
        ],
        out_specs=pl.BlockSpec((TM, cout_pad), lambda m: (m, 0)),
        compiler_params=pltpu.CompilerParams(dimension_semantics=("parallel",)),
    )(patches, wmat, bmat)
    return out.reshape(B, Ho, Wo, cout_pad)


# ----------------------- fused SingleMambaBlock kernel -----------------------
def _make_mamba_kernel(TL, D_real, Dp, Ip, S, d_conv, CH, eps=1e-5):
    C0 = 8                       # row offset where xin starts in the conv buffer
    assert d_conv - 1 <= C0
    NCH = TL // CH

    def kernel(x_ref, w_in_ref, b_in_ref, cw_ref, cb_ref, w_dt_ref, dtb_ref,
               w_bc_ref, a_neg_ref, d_par_ref, w_out_ref, o_ref,
               h_ref, xbuf_ref, y_ref, dt_ref, dtx_ref, bc_ref, sk_ref, gz_ref):
        l_idx = pl.program_id(1)

        # NOTE: the carried scan state (h_ref) and the depthwise-conv tail
        # (xbuf_ref rows [C0-(d_conv-1), C0)) require the token axis to remain
        # the innermost, sequential ("arbitrary") grid axis.
        @pl.when(l_idx == 0)
        def _():
            h_ref[...] = jnp.zeros_like(h_ref)
            xbuf_ref[pl.ds(0, C0), :] = jnp.zeros((C0, Ip), jnp.float32)

        x = x_ref[0].astype(jnp.float32)                       # [TL, Dp]; pads are 0

        # LayerNorm statistics over the D_real real channels (zero padding keeps
        # the sums exact); gamma/beta are folded into w_in / b_in.
        inv_d = 1.0 / D_real
        mu = jnp.sum(x, axis=-1, keepdims=True) * inv_d
        ex2 = jnp.sum(x * x, axis=-1, keepdims=True) * inv_d
        var = jnp.maximum(ex2 - mu * mu, 0.0)
        xn = (x - mu) * lax.rsqrt(var + eps)

        # fused in_proj (LN affine folded): x-branch | gate z
        proj = jnp.dot(xn.astype(jnp.bfloat16), w_in_ref[...],
                       preferred_element_type=jnp.float32) + b_in_ref[...]
        xin = proj[:, :Ip]                                     # [TL, Ip]
        z = proj[:, Ip:]
        gz_ref[...] = z * _sigmoid(z)                          # SiLU gate for later

        # causal depthwise conv along tokens; carry (last d_conv-1 tokens of the
        # previous tile) lives in rows [C0-(d_conv-1), C0) of the buffer, so the
        # tap reads are plain in-buffer slices (no concatenate/relayout).
        xbuf_ref[pl.ds(C0, TL), :] = xin                       # aligned store
        cw = cw_ref[...]                                       # [d_conv, Ip]
        acc = xin * cw[d_conv - 1:d_conv, :] + cb_ref[...]
        for k in range(d_conv - 1):
            acc = acc + xbuf_ref[pl.ds(C0 - (d_conv - 1) + k, TL), :] * cw[k:k + 1, :]
        xc = acc * _sigmoid(acc)                               # SiLU
        # carry for the next tile
        tail = xbuf_ref[pl.ds(C0 + TL - (d_conv - 1), d_conv - 1), :]
        xbuf_ref[pl.ds(C0 - (d_conv - 1), d_conv - 1), :] = tail

        # x_proj: dt (low-rank projection folded) and B|C, written to scratch
        xc_bf = xc.astype(jnp.bfloat16)
        dt = _softplus(jnp.dot(xc_bf, w_dt_ref[...],
                               preferred_element_type=jnp.float32) + dtb_ref[...])
        dt_ref[...] = dt
        dtx_ref[...] = dt * xc
        bc_ref[...] = jnp.dot(xc_bf, w_bc_ref[...], preferred_element_type=jnp.float32)
        sk_ref[...] = xc * d_par_ref[...]                      # skip term D*x

        # chunked selective scan: per-token dA/dBx computed inside the unrolled
        # recurrence; only h ([S, Ip]) and one y row are live.  Each chunk's y
        # rows are written (aligned) into the y scratch.
        def chunk_body(c, h):
            off = pl.multiple_of(c * CH, CH)
            dt_c = dt_ref[pl.ds(off, CH), :]                   # [CH, Ip]
            dtx_c = dtx_ref[pl.ds(off, CH), :]                 # [CH, Ip]
            bc_c = bc_ref[pl.ds(off, CH), :]                   # [CH, 2*S]
            bT = bc_c[:, :S][:, :, None]                       # [CH, S, 1]
            cT = bc_c[:, S:2 * S][:, :, None]                  # [CH, S, 1]
            a_neg = a_neg_ref[...]                             # [S, Ip]
            rows = []
            for t in range(CH):                                # unrolled recurrence
                dA = jnp.exp(dt_c[t:t + 1, :] * a_neg)         # [S, Ip]
                h = dA * h + bT[t] * dtx_c[t:t + 1, :]
                rows.append(jnp.sum(cT[t] * h, axis=0, keepdims=True))
            y_ref[pl.ds(off, CH), :] = jnp.concatenate(rows, axis=0)
            return h

        h_fin = lax.fori_loop(0, NCH, chunk_body, h_ref[...])
        h_ref[...] = h_fin

        # skip term, SiLU gate, out_proj, external residual Mamba(x) + x
        y = (y_ref[...] + sk_ref[...]) * gz_ref[...]
        out = jnp.dot(y.astype(jnp.bfloat16), w_out_ref[...],
                      preferred_element_type=jnp.float32)      # [TL, Dp]
        o_ref[0] = (out + x_ref[0].astype(jnp.float32)).astype(o_ref.dtype)

    return kernel


def _prep_mamba_weights(p, D, Dp, Ip, S, d_conv):
    """Fold LN affine / low-rank dt, zero-pad every weight to lane-dense widths."""
    bf16 = jnp.bfloat16
    g = p["ln_g"].reshape(D, 1)
    b = p["ln_b"].reshape(1, D)
    wx = _pad2d(g * p["w_in_x"], Dp, Ip)
    wz = _pad2d(g * p["w_in_z"], Dp, Ip)
    w_in = jnp.concatenate([wx, wz], axis=1).astype(bf16)               # [Dp, 2*Ip]
    b_in = jnp.concatenate([_pad2d(b @ p["w_in_x"], 1, Ip),
                            _pad2d(b @ p["w_in_z"], 1, Ip)], axis=1)    # [1, 2*Ip]
    cw = _pad2d(p["conv_w"], d_conv, Ip)
    cb = _pad2d(p["conv_b"], 1, Ip)
    # TODO(synk): on v5e (197 TF/s MXU) keep the low-rank dt projection as two
    # matmuls when d_inner is large; the dense fold trades FLOPs for fusion.
    w_dt = _pad2d(jnp.dot(p["w_dt_in"], p["w_dt"]), Ip, Ip).astype(bf16)
    dtb = _pad2d(p["dt_bias"], 1, Ip)
    w_bc = _pad2d(jnp.concatenate([p["w_B"], p["w_C"]], axis=1), Ip, 2 * S).astype(bf16)
    a_neg = _pad2d(-jnp.exp(p["a_log_t"]), S, Ip)                       # [S, Ip]
    d_par = _pad2d(p["d_param"], 1, Ip)
    w_out = _pad2d(p["w_out"], Ip, Dp).astype(bf16)
    return [w_in, b_in, cw, cb, w_dt, dtb, w_bc, a_neg, d_par, w_out]


def single_mamba_block(tokens_pad, p, D):
    """tokens_pad: [B, L, Dp] bf16 (channels >= D zero-padded, Dp lane-dense).
    Returns Mamba(LayerNorm(x)) + x as [B, L, Dp] float32 (pad channels are 0)."""
    B, L, Dp = tokens_pad.shape
    d_inner = p["w_in_x"].shape[1]
    S = p["w_B"].shape[1]
    d_conv = p["conv_w"].shape[0]
    Ip = _round_up(d_inner, LANE)
    assert Dp >= D

    TL = _pick_tile(L, (512, 256, 128, 64, 32, 16, 8))   # token tile per grid step
    NLT = L // TL
    CH = 8                                               # scan chunk inside the tile
    while TL % CH:
        CH //= 2

    weights = _prep_mamba_weights(p, D, Dp, Ip, S, d_conv)

    def wspec(a):
        nd = a.ndim
        def imap(b, l):
            return (0,) * nd
        return pl.BlockSpec(a.shape, imap)

    in_specs = [pl.BlockSpec((1, TL, Dp), lambda b, l: (b, l, 0))]
    in_specs += [wspec(a) for a in weights]

    kernel = _make_mamba_kernel(TL, D, Dp, Ip, S, d_conv, CH)

    out = pl.pallas_call(
        kernel,
        out_shape=jax.ShapeDtypeStruct((B, L, Dp), jnp.float32),
        grid=(B, NLT),
        in_specs=in_specs,
        out_specs=pl.BlockSpec((1, TL, Dp), lambda b, l: (b, l, 0)),
        scratch_shapes=[
            pltpu.VMEM((S, Ip), jnp.float32),        # h: scan state, carried over token tiles
            pltpu.VMEM((TL + 8, Ip), jnp.float32),   # depthwise-conv buffer (+ carry rows)
            pltpu.VMEM((TL, Ip), jnp.float32),       # y: scan output
            pltpu.VMEM((TL, Ip), jnp.float32),       # dt
            pltpu.VMEM((TL, Ip), jnp.float32),       # dt * xc
            pltpu.VMEM((TL, 2 * S), jnp.float32),    # B | C
            pltpu.VMEM((TL, Ip), jnp.float32),       # skip term xc * D
            pltpu.VMEM((TL, Ip), jnp.float32),       # SiLU(z) gate
        ],
        # TODO(synk): on v7x add a second "parallel" axis (split over d_inner)
        # when B is small/odd so both TensorCores stay loaded.
        compiler_params=pltpu.CompilerParams(
            dimension_semantics=("parallel", "arbitrary")),
    )(tokens_pad, *weights)
    return out


# ------------------------------ Mamba_block ----------------------------------
def mamba_block_forward(x_nhwc, conv_p, mamba_p, *, kernel_size=4, stride=2, pad=1):
    Cout = conv_p["w"].shape[0]
    Cp = _round_up(Cout, LANE)
    feat = conv2d_reflect(x_nhwc, conv_p["w"], conv_p["b"], Cp,
                          kernel_size=kernel_size, stride=stride, pad=pad)
    B, Ho, Wo, _ = feat.shape
    tokens = feat.reshape(B, Ho * Wo, Cp)                  # lane-dense bf16
    out_tokens = single_mamba_block(tokens, mamba_p, Cout)  # Mamba(x) + x, [B, L, Cp] f32
    return out_tokens[..., :Cout].reshape(B, Ho, Wo, Cout)


# ------------------------ deterministic parameter init -----------------------
def init_params(key, in_channels, out_channels, *, kernel_size=4,
                d_state=16, d_conv=4, expand=2):
    D = out_channels
    d_inner = expand * D
    dt_rank = max(1, math.ceil(D / 16))
    ks = jax.random.split(key, 12)

    def rn(k, shape, scale):
        return jax.random.normal(k, shape, jnp.float32) * scale

    conv_p = {
        "w": rn(ks[0], (out_channels, in_channels, kernel_size, kernel_size),
                1.0 / math.sqrt(in_channels * kernel_size * kernel_size)),
        "b": rn(ks[1], (out_channels,), 0.02),
    }

    a_log = jnp.log(jnp.arange(1, d_state + 1, dtype=jnp.float32))          # [d_state]
    a_log_t = jnp.broadcast_to(a_log[:, None], (d_state, d_inner))          # A_log.T
    dt_bias = jnp.log(jnp.expm1(jnp.linspace(0.001, 0.1, d_inner,
                                             dtype=jnp.float32))).reshape(1, d_inner)

    mamba_p = {
        "ln_g": jnp.ones((1, D), jnp.float32),
        "ln_b": jnp.zeros((1, D), jnp.float32),
        "w_in_x": rn(ks[2], (D, d_inner), 1.0 / math.sqrt(D)),
        "w_in_z": rn(ks[3], (D, d_inner), 1.0 / math.sqrt(D)),
        "conv_w": rn(ks[4], (d_conv, d_inner), 1.0 / math.sqrt(d_conv)),
        "conv_b": rn(ks[5], (1, d_inner), 0.02),
        "w_dt_in": rn(ks[6], (d_inner, dt_rank), 1.0 / math.sqrt(d_inner)),
        "w_B": rn(ks[7], (d_inner, d_state), 1.0 / math.sqrt(d_inner)),
        "w_C": rn(ks[8], (d_inner, d_state), 1.0 / math.sqrt(d_inner)),
        "w_dt": rn(ks[9], (dt_rank, d_inner), 1.0 / math.sqrt(dt_rank)),
        "dt_bias": dt_bias,
        "a_log_t": a_log_t,
        "d_param": jnp.ones((1, d_inner), jnp.float32),
        "w_out": rn(ks[10], (d_inner, D), 1.0 / math.sqrt(d_inner)),
    }
    return conv_p, mamba_p


if __name__ == "__main__":
    key = jax.random.PRNGKey(0)
    B, Cin, H, W = 2, 4, 16, 16
    Cout = 32
    k_x, k_p = jax.random.split(key)

    # reference input in PyTorch's NCHW; kernel uses NHWC internally
    x_nchw = jax.random.normal(k_x, (B, Cin, H, W), jnp.float32)
    x_nhwc = jnp.transpose(x_nchw, (0, 2, 3, 1))

    conv_p, mamba_p = init_params(k_p, Cin, Cout)
    y = mamba_block_forward(x_nhwc, conv_p, mamba_p)     # [B, H/2, W/2, Cout] NHWC
    y = jax.block_until_ready(y)

    assert y.shape == (B, H // 2, W // 2, Cout)
    assert bool(jnp.all(jnp.isfinite(y)))
    print("KERNEL_OK")
</pallas_src>

<mosaic_0001>
module attributes {stable_mosaic.version = 11 : i64} {
  func.func @_conv_mm_kernel(%arg0: i32, %arg1: memref<128x64xbf16, #tpu.memory_space<vmem>>, %arg2: memref<64x128xbf16, #tpu.memory_space<vmem>>, %arg3: memref<1x128xf32, #tpu.memory_space<vmem>>, %arg4: memref<128x128xbf16, #tpu.memory_space<vmem>>) attributes {dimension_semantics = [#tpu.dimension_semantics<parallel>], iteration_bounds = array<i64: 1>, scalar_prefetch = 0 : i64, scratch_operands = 0 : i64, tpu.core_type = #tpu.core_type<tc>, window_params = [{transform_indices = @transform_0, window_bounds = array<i64: 128, 64>}, {pipeline_mode = #tpu.pipeline_mode<synchronous>, transform_indices = @transform_1, window_bounds = array<i64: 64, 128>}, {pipeline_mode = #tpu.pipeline_mode<synchronous>, transform_indices = @transform_2, window_bounds = array<i64: 1, 128>}, {transform_indices = @transform_3, window_bounds = array<i64: 128, 128>}]} {
    %c0 = arith.constant 0 : index
    %c0_0 = arith.constant 0 : index
    %0 = vector.load %arg1[%c0, %c0_0] : memref<128x64xbf16, #tpu.memory_space<vmem>>, vector<128x64xbf16>
    %c0_1 = arith.constant 0 : index
    %c0_2 = arith.constant 0 : index
    %1 = vector.load %arg2[%c0_1, %c0_2] : memref<64x128xbf16, #tpu.memory_space<vmem>>, vector<64x128xbf16>
    %cst = arith.constant dense<0.000000e+00> : vector<128x128xf32>
    %2 = tpu.matmul %0, %1, %cst {dimension_numbers = #tpu.dot_dimension_numbers<[1], [0], [0], [1], [0, 0, 1, 1], [], []>} : vector<128x64xbf16>, vector<64x128xbf16>, vector<128x128xf32> -> vector<128x128xf32>
    %c0_3 = arith.constant 0 : index
    %c0_4 = arith.constant 0 : index
    %3 = vector.load %arg3[%c0_3, %c0_4] : memref<1x128xf32, #tpu.memory_space<vmem>>, vector<1x128xf32>
    %4 = vector.broadcast %3 : vector<1x128xf32> to vector<128x128xf32>
    %5 = arith.addf %2, %4 : vector<128x128xf32>
    %6 = arith.truncf %5 : vector<128x128xf32> to vector<128x128xbf16>
    %c0_5 = arith.constant 0 : index
    %c0_6 = arith.constant 0 : index
    %7 = vector.load %arg4[%c0_5, %c0_6] : memref<128x128xbf16, #tpu.memory_space<vmem>>, vector<128x128xbf16>
    tpu.vector_store %arg4[%c0_5, %c0_6], %6 {strides = array<i32>} : memref<128x128xbf16, #tpu.memory_space<vmem>>, vector<128x128xbf16>,
    return
  }
  func.func @transform_0(%arg0: i32) -> (i32, i32) {
    %c0_i32 = arith.constant 0 : i32
    %c0_i32_0 = arith.constant 0 : i32
    return %arg0, %c0_i32 : i32, i32
  }
  func.func @transform_1(%arg0: i32) -> (i32, i32) {
    %c0_i32 = arith.constant 0 : i32
    %c0_i32_0 = arith.constant 0 : i32
    %c0_i32_1 = arith.constant 0 : i32
    return %c0_i32, %c0_i32_0 : i32, i32
  }
  func.func @transform_2(%arg0: i32) -> (i32, i32) {
    %c0_i32 = arith.constant 0 : i32
    %c0_i32_0 = arith.constant 0 : i32
    %c0_i32_1 = arith.constant 0 : i32
    return %c0_i32, %c0_i32_0 : i32, i32
  }
  func.func @transform_3(%arg0: i32) -> (i32, i32) {
    %c0_i32 = arith.constant 0 : i32
    %c0_i32_0 = arith.constant 0 : i32
    return %arg0, %c0_i32 : i32, i32
  }
}

</mosaic_0001>

<bundles_post_ra>
// kernel: tpu_custom_call.1
= control target key start
LH: loop header
LB: loop body
LE: loop exit
PB: predicated region body
PF: predicated region fallthrough
CT: control target
= control target key end

     0   :  { %vm111_vm0 = vcmask 523264   ;;  %s594_s0 = inlined_call_operand.vmem [shape: bf16[128,64], index: 0, kind: input, shape index: {}]   ;;  %s595_s1 = inlined_call_operand.vmem [shape: bf16[64,128], index: 1, kind: input, shape index: {}]   ;;  %s596_s2 = inlined_call_operand.vmem [shape: f32[1,128], index: 2, kind: input, shape index: {}]   ;;  %s597_s3 = inlined_call_operand.hbm [shape: bf16[128,128], index: 3, kind: output, shape index: {}]  }
   0x1   :  { %v476_v0 = vld [vmem:[%s595_s1] sm:$0xff]   ;;  %v477_v1 = vld [vmem:[%s595_s1 + $0x8] sm:$0xff]   ;;  %v478_v2 = vld [vmem:[%s595_s1 + $0x10] sm:$0xff]  }
   0x2   :  { %441 = vmatprep.subr.bf16.mxu0 %v476_v0  ;;  %465 = vmatprep.subr.bf16.mxu1 %v476_v0  ;;  %v480_v3 = vld [vmem:[%s594_s0] sm:$0xff]   ;;  %v479_v5 = vld [vmem:[%s595_s1 + $0x18] sm:$0xff]  }
   0x3   :  { %442 = vmatpush3.bf16.msra.mxu0 %v476_v0  ;;  %469 = vmatpush3.bf16.msra.mxu1 %v476_v0  ;;  %v481_v4 = vld [vmem:[%s594_s0 + $0x20] sm:$0xff]  }
   0x4   :  { %443 = vmatprep.subr.bf16.mxu0 %v477_v1  ;;  %466 = vmatprep.subr.bf16.mxu1 %v477_v1 }
   0x5   :  { %449 = vmatprep.mubr.msk.bf16.mxu0 %vm111_vm0, %v480_v3  ;;  %457 = vmatprep.mubr.msk.bf16.mxu1 %vm111_vm0, %v481_v4 }
   0x7   :  { %444 = vmatpush3.bf16.msra.mxu0 %v477_v1  ;;  %470 = vmatpush3.bf16.msra.mxu1 %v477_v1 }
   0x8   :  { %445 = vmatprep.subr.bf16.mxu0 %v478_v2  ;;  %467 = vmatprep.subr.bf16.mxu1 %v478_v2 }
   0xb   :  { %446 = vmatpush3.bf16.msra.mxu0 %v478_v2  ;;  %471 = vmatpush3.bf16.msra.mxu1 %v478_v2 }
   0xc   :  { %447 = vmatprep.subr.bf16.mxu0 %v479_v5  ;;  %468 = vmatprep.subr.bf16.mxu1 %v479_v5 }
   0xd   :  { %8 = vsyncpa [#allocation3], 0  ;;  %v482_v6 = vld [vmem:[%s594_s0 + $0x8] sm:$0xff]   ;;  %v484_v8 = vld [vmem:[%s594_s0 + $0x10] sm:$0xff]  }
   0xe   :  { %v483_v7 = vld [vmem:[%s594_s0 + $0x28] sm:$0xff]   ;;  %v485_v9 = vld [vmem:[%s594_s0 + $0x30] sm:$0xff]   ;;  %v486_v10 = vld [vmem:[%s594_s0 + $0x18] sm:$0xff]  }
   0xf   :  { %448 = vmatpush3.bf16.msra.mxu0 %v479_v5  ;;  %472 = vmatpush3.bf16.msra.mxu1 %v479_v5  ;;  %v487_v11 = vld [vmem:[%s594_s0 + $0x38] sm:$0xff]   ;;  %v329_v13 = vld [vmem:[%s596_s2] ss:$0 sm:$0xff]  ;;  %s512_s0 = smov [#allocation2]  }
  0x10   :  { %s318_s2 = sshll.u32 %s512_s0, 4  ;;  %s319_s2 = int_to_ptr.vmem [resolvable:$true] %s318_s2 }
  0x11   :  { %s488_s10 = scalar_lea.vmem %s319_s2, 1024  ;;  %p493_p1 = scmp.lt.s32.totalorder %s319_s2, %s319_s2 }
  0x12   :  { %450 = vmatmul.mubr.msk.bf16.vlgmr.msra.gmra.mrb[0].mxu0 %vm111_vm0, %v482_v6  ;;  %458 = vmatmul.mubr.msk.bf16.vlgmr.msra.gmra.mrb[0].mxu1 %vm111_vm0, %v483_v7  ;;  %p489_p0 = scmp.ne.s32.totalorder %s319_s2, %s488_s10  ;;  %p494_p2 = scmp.lt.s32.totalorder %s488_s10, %s488_s10 }
  0x13   :  { %453 = vmatprep.mubr.msk.bf16.mxu0 %vm111_vm0, %v484_v8  ;;  %461 = vmatprep.mubr.msk.bf16.mxu1 %vm111_vm0, %v485_v9 }
  0x14   :  { %p495_p3 = por %p494_p2, %p493_p1 }
  0x16   :  { %p496_p4 = pnand %p495_p3, %p489_p0 }
  0x1a   :  { %454 = vmatmul.mubr.msk.bf16.gmra.mrb[4].mxu0 %vm111_vm0, %v486_v10  ;;  %462 = vmatmul.mubr.msk.bf16.gmra.mrb[4].mxu1 %vm111_vm0, %v487_v11 }
  0xe5   :  { %v451_v12 = vpop.f32.mrb[0].mxu0  ;;  %v459_v14 = vpop.f32.mrb[0].mxu1 }
  0xe6   :  { %v170_v15 = vpop.f32.mrb[1].mxu0  ;;  %v202_v16 = vpop.f32.mrb[1].mxu1  ;;  %v179_v19 = vadd.f32 %v451_v12, %v329_v13  ;;  %v211_v20 = vadd.f32 %v459_v14, %v329_v13 }
  0xe7   :  { %v452_v17 = vpop.f32.mrb[2].mxu0  ;;  %v460_v18 = vpop.f32.mrb[2].mxu1  ;;  %v171_v25 = vadd.f32 %v329_v13, %v170_v15  ;;  %v203_v26 = vadd.f32 %v329_v13, %v202_v16 }
  0xe8   :  { %v182_v21 = vadd.f32 %v452_v17, %v329_v13  ;;  %v214_v22 = vadd.f32 %v460_v18, %v329_v13  ;;  %v173_v23 = vpop.f32.mrb[3].mxu0  ;;  %v205_v24 = vpop.f32.mrb[3].mxu1 }
  0xe9   :  { %v174_v27 = vadd.f32 %v329_v13, %v173_v23  ;;  %v206_v28 = vadd.f32 %v329_v13, %v205_v24 }
  0xea   :  { %v390_v29 = vpack.c.bf16 %v182_v21, %v179_v19  ;;  %v410_v30 = vpack.c.bf16 %v214_v22, %v211_v20 }
  0xeb   :  { %v385_v31 = vpack.c.bf16 %v174_v27, %v171_v25  ;;  %v405_v32 = vpack.c.bf16 %v206_v28, %v203_v26 }
  0xec   :  { %422 = vst [vmem:[#allocation2 + $0x8] sm:$0xff] %v390_v29   ;;  %426 = vst [vmem:[#allocation2 + $0x28] sm:$0xff] %v410_v30  }
  0xed   :  { %386 = vst [vmem:[#allocation2] sm:$0xff] %v385_v31   ;;  %425 = vst [vmem:[#allocation2 + $0x20] sm:$0xff] %v405_v32   ;;  %v455_v33 = vpop.f32.mrb[4].mxu0  ;;  %v463_v34 = vpop.f32.mrb[4].mxu1 }
  0xee   :  { %v186_v35 = vpop.f32.mrb[5].mxu0  ;;  %v218_v36 = vpop.f32.mrb[5].mxu1  ;;  %v195_v39 = vadd.f32 %v455_v33, %v329_v13  ;;  %v227_v40 = vadd.f32 %v463_v34, %v329_v13 }
  0xef   :  { %v456_v37 = vpop.f32.mrb[6].mxu0  ;;  %v464_v38 = vpop.f32.mrb[6].mxu1  ;;  %v187_v45 = vadd.f32 %v329_v13, %v186_v35  ;;  %v219_v46 = vadd.f32 %v329_v13, %v218_v36 }
  0xf0   :  { %v198_v41 = vadd.f32 %v456_v37, %v329_v13  ;;  %v230_v42 = vadd.f32 %v464_v38, %v329_v13  ;;  %v189_v43 = vpop.f32.mrb[7].mxu0  ;;  %v221_v44 = vpop.f32.mrb[7].mxu1 }
  0xf1   :  { %v190_v47 = vadd.f32 %v329_v13, %v189_v43  ;;  %v222_v48 = vadd.f32 %v329_v13, %v221_v44 }
  0xf2   :  { %v400_v49 = vpack.c.bf16 %v198_v41, %v195_v39  ;;  %v420_v50 = vpack.c.bf16 %v230_v42, %v227_v40 }
  0xf3   :  { %v395_v51 = vpack.c.bf16 %v190_v47, %v187_v45  ;;  %v415_v52 = vpack.c.bf16 %v222_v48, %v219_v46 }
  0xf4   :  { %424 = vst [vmem:[#allocation2 + $0x18] sm:$0xff] %v400_v49   ;;  %428 = vst [vmem:[#allocation2 + $0x38] sm:$0xff] %v420_v50  }
  0xf5   :  { %423 = vst [vmem:[#allocation2 + $0x10] sm:$0xff] %v395_v51   ;;  %427 = vst [vmem:[#allocation2 + $0x30] sm:$0xff] %v415_v52  }
  0xf6   :  { %499 = shalt.err (!%p496_p4)
}
  0xf7   :  { %s500_s13 = scalar_lea.hbm %s597_s3, 1024 }
  0xf8   :  { %p501_p5 = scmp.ne.s32.totalorder %s597_s3, %s500_s13  ;;  %p504_p6 = scmp.lt.u32.totalorder %s500_s13, %s597_s3 }
  0xfa   :  { %p506_p7 = pnand %p504_p6, %p501_p5 }
  0xfc   :  { %509 = shalt.err (!%p506_p7)
}
  0xfd   :  { %s513_s18 = smov 64   ;;  %s514_s19 = smov 4  }
  0xfe   :  { %324 = dma.vmem_to_hbm [thread:$0]  %s319_s2, 1024, %s597_s3, [#allocation3], %s513_s18, %s513_s18, %s514_s19  }
  0xff   :  { %510 = dma.done.wait [#allocation3], 1024  }
 0x100   :  { %511 = vsyncadd [#allocation3], 4294966272 }
 0x101   :  { %328 = vsyncpa [#allocation3], 1 }

</bundles_post_ra>
